<compile_context>
chip_gen: v5e
topology: v5e:2x2
jax: 0.10.0
libtpu: 0.0.40
codegen_flags: <defaults>
</compile_context>

<pallas_src>
import functools

import jax
import jax.numpy as jnp
import numpy as np
from jax.experimental import pallas as pl
from jax.experimental.pallas import tpu as pltpu

try:  # Prefer scipy's Hungarian solver if present; fall back to pure numpy below.
    from scipy.optimize import linear_sum_assignment as _scipy_lsa
except Exception:  # pragma: no cover
    _scipy_lsa = None

_EPS2 = 1e-24  # (torch.nn.functional.normalize eps = 1e-12) ** 2


def _round_up(x, m):
    return ((x + m - 1) // m) * m


# ---------------------------------------------------------------------------
# Pallas kernels
# ---------------------------------------------------------------------------
def _normalize_rows(x32):
    """F.normalize(x, dim=1) for a (TN, D) tile: x * rsqrt(max(||x||^2, eps^2))."""
    sq = jnp.sum(x32 * x32, axis=1, keepdims=True)
    return x32 * jax.lax.rsqrt(jnp.maximum(sq, jnp.float32(_EPS2)))


def _normalize_cols(x32):
    """Same normalization along axis 0 for a (D, TM) tile."""
    sq = jnp.sum(x32 * x32, axis=0, keepdims=True)
    return x32 * jax.lax.rsqrt(jnp.maximum(sq, jnp.float32(_EPS2)))


def _cost_kernel_l2(y_ref, gT_ref, out_ref, *, power, normalize):
    """p == 2 path: MXU identity dist^2 = ||y||^2 + ||g||^2 - 2 y.g^T."""
    y = y_ref[0]        # (TN, D), original dtype (bf16 stays bf16 for the MXU)
    gT = gT_ref[0]      # (D, TM)

    if normalize:
        y = _normalize_rows(y.astype(jnp.float32)).astype(y_ref.dtype)
        gT = _normalize_cols(gT.astype(jnp.float32)).astype(gT_ref.dtype)

    y32 = y.astype(jnp.float32)
    gT32 = gT.astype(jnp.float32)
    yn2 = jnp.sum(y32 * y32, axis=1, keepdims=True)      # (TN, 1)
    gn2 = jnp.sum(gT32 * gT32, axis=0, keepdims=True)    # (1, TM)

    dot = jax.lax.dot_general(                           # (TN, TM), f32 accumulation
        y, gT, (((1,), (0,)), ((), ())), preferred_element_type=jnp.float32)

    # Clamp before sqrt: catastrophic cancellation can give tiny negatives.
    d2 = jnp.maximum(yn2 + gn2 - 2.0 * dot, 0.0)
    if power == 1.0:
        dist = jnp.sqrt(d2)
    elif power == 2.0:
        dist = d2                                        # (sqrt(d2))**2, skip sqrt
    else:
        dist = jnp.power(d2, jnp.float32(0.5 * power))
    out_ref[0] = dist.astype(out_ref.dtype)


def _cost_kernel_lp(y_ref, gT_ref, out_ref, *, p, power, normalize):
    """General Minkowski p (incl. the default p == 1): accumulate over D.

    Keeps a (TN, TM) f32 accumulator in registers and never materializes the
    (N, M, D) broadcast intermediate.
    """
    y = y_ref[0].astype(jnp.float32)     # (TN, D)   elementwise math in f32 (v5e-safe)
    gT = gT_ref[0].astype(jnp.float32)   # (D, TM)
    if normalize:
        y = _normalize_rows(y)
        gT = _normalize_cols(gT)

    tn = y.shape[0]
    tm = gT.shape[1]
    d_total = y.shape[1]

    # TODO(synk): static unroll over D (compile time grows with D); a lax.fori_loop
    # would need dynamic lane-dim slicing of y, which Mosaic does not reliably
    # support, so the fully static form is kept for robustness.
    acc = jnp.zeros((tn, tm), jnp.float32)
    for d in range(d_total):
        diff = jnp.abs(y[:, d:d + 1] - gT[d:d + 1, :])   # (TN, TM) broadcast, VPU
        if p == 1.0:
            acc = acc + diff
        else:
            acc = acc + jnp.power(diff, jnp.float32(p))

    exponent = power / p                                  # (acc ** (1/p)) ** power
    dist = acc if exponent == 1.0 else jnp.power(acc, jnp.float32(exponent))
    out_ref[0] = dist.astype(out_ref.dtype)


@functools.partial(jax.jit, static_argnames=("p", "power", "normalize"))
def pairwise_cost_pallas(predictions, targets, *, p=1.0, power=1.0, normalize=False):
    """predictions [B, N, D], targets [B, M, D] -> cdist(y, gt, p)**power, [B, N, M] f32."""
    B, N, D = predictions.shape
    Bt, M, Dt = targets.shape
    assert B == Bt and D == Dt

    # Tile sizes: M on the lane axis (multiple of 128 -> lane-dense stores),
    # N on sublanes.  Widen TM to 256 when M divides evenly -> bigger lane-dense
    # output slabs and fewer grid steps.  Footprints stay well under scoped VMEM.
    TN = min(128, _round_up(N, 8))
    Mp = _round_up(M, 128)
    TM = 256 if (Mp % 256 == 0) else 128
    Np = _round_up(N, TN)

    y = predictions
    if Np != N:
        y = jnp.pad(y, ((0, 0), (0, Np - N), (0, 0)))
    gT = jnp.swapaxes(targets, 1, 2)                      # [B, D, M]
    if Mp != M:
        gT = jnp.pad(gT, ((0, 0), (0, 0), (0, Mp - M)))

    p = float(p)
    power = float(power)
    if p == 2.0:
        kernel = functools.partial(_cost_kernel_l2, power=power,
                                   normalize=bool(normalize))
    else:
        kernel = functools.partial(_cost_kernel_lp, p=p, power=power,
                                   normalize=bool(normalize))

    cost = pl.pallas_call(
        kernel,
        out_shape=jax.ShapeDtypeStruct((B, Np, Mp), jnp.float32),
        grid_spec=pltpu.PrefetchScalarGridSpec(
            num_scalar_prefetch=0,
            grid=(B, Np // TN, Mp // TM),
            in_specs=[
                pl.BlockSpec((1, TN, D), lambda b, i, j: (b, i, 0)),
                pl.BlockSpec((1, D, TM), lambda b, i, j: (b, 0, j)),
            ],
            out_specs=pl.BlockSpec((1, TN, TM), lambda b, i, j: (b, i, j)),
        ),
        compiler_params=pltpu.CompilerParams(
            dimension_semantics=("parallel", "parallel", "parallel"),
        ),
    )(y, gT)
    return cost[:, :N, :M]


# ---------------------------------------------------------------------------
# Host-side glue: linear_sum_assignment (Hungarian / Jonker-Volgenant, O(n^3))
# ---------------------------------------------------------------------------
# TODO(synk): the Hungarian assignment is inherently sequential / data-dependent
# control flow with no clean Pallas equivalent; it runs on host (as scipy does
# in the reference module).
def _linear_sum_assignment_np(cost):
    cost = np.asarray(cost, dtype=np.float64)
    transposed = False
    if cost.shape[0] > cost.shape[1]:
        cost = cost.T
        transposed = True
    n, m = cost.shape
    INF = 1e18
    u = np.zeros(n + 1)
    v = np.zeros(m + 1)
    p = np.zeros(m + 1, dtype=np.int64)
    way = np.zeros(m + 1, dtype=np.int64)
    for i in range(1, n + 1):
        p[0] = i
        j0 = 0
        minv = np.full(m + 1, INF)
        used = np.zeros(m + 1, dtype=bool)
        while True:
            used[j0] = True
            i0 = p[j0]
            delta = INF
            j1 = -1
            for j in range(1, m + 1):
                if not used[j]:
                    cur = cost[i0 - 1, j - 1] - u[i0] - v[j]
                    if cur < minv[j]:
                        minv[j] = cur
                        way[j] = j0
                    if minv[j] < delta:
                        delta = minv[j]
                        j1 = j
            for j in range(m + 1):
                if used[j]:
                    u[p[j]] += delta
                    v[j] -= delta
                else:
                    minv[j] -= delta
            j0 = j1
            if p[j0] == 0:
                break
        while j0:
            j1 = way[j0]
            p[j0] = p[j1]
            j0 = j1
    ans = np.zeros(n + 1, dtype=np.int64)
    for j in range(1, m + 1):
        if p[j] != 0:
            ans[p[j]] = j
    rows = np.arange(n, dtype=np.int64)
    cols = ans[1:] - 1
    if transposed:
        row_ind, col_ind = cols, rows
        order = np.argsort(row_ind, kind="stable")
        return row_ind[order], col_ind[order]
    return rows, cols


def _linear_sum_assignment(cost):
    if _scipy_lsa is not None:
        r, c = _scipy_lsa(np.asarray(cost))
        return np.asarray(r, dtype=np.int64), np.asarray(c, dtype=np.int64)
    return _linear_sum_assignment_np(cost)


# ---------------------------------------------------------------------------
# HungarianMatcher forward (JAX/Pallas version)
# ---------------------------------------------------------------------------
class HungarianMatcherPallas:
    def __init__(self, cost: float = 1, cost_power: float = 1, norm: float = 1,
                 normalize: bool = False):
        self.cost = cost
        self.cost_power = cost_power
        self.normalize = normalize

    def __call__(self, predictions, targets):
        predictions = jnp.asarray(predictions)
        targets = jnp.asarray(targets)
        if predictions.ndim in (1, 2):
            predictions = predictions[None]
        if targets.ndim in (1, 2):
            targets = targets[None]

        num_gt_counts = targets.shape[1]

        # Hot path on TPU: full [B, N, M] pairwise cost matrix.
        cost_dev = pairwise_cost_pallas(
            predictions, targets,
            p=float(self.cost), power=float(self.cost_power),
            normalize=bool(self.normalize))

        # Valid-gt bookkeeping from a tiny [B, M] device reduction.
        row_sums = np.asarray(jax.device_get(jnp.sum(targets, axis=-1)))
        gt_nonz_list = [np.nonzero(row_sums[b])[0] for b in range(row_sums.shape[0])]

        # Only transfer the columns the Hungarian step can actually read.
        max_col = max([int(g.max()) + 1 for g in gt_nonz_list if g.size > 0], default=0)
        m_slice = max(max_col, 1)
        cost_host = np.asarray(jax.device_get(cost_dev[:, :, :m_slice]))

        inds = []
        for b in range(predictions.shape[0]):
            gt_nonz = gt_nonz_list[b]
            if not np.array_equal(gt_nonz, np.arange(gt_nonz.size)):
                print(f"Error: the nonzeros should be first gt_nonz={gt_nonz!r} "
                      f"{np.arange(gt_nonz.size)!r}")
            if gt_nonz.size == 0:
                y_inds = np.zeros((0,), dtype=np.int64)
                gt_inds = []
            else:
                cost = cost_host[b][:, gt_nonz]
                y_inds, gt_inds = _linear_sum_assignment(cost)
                gt_inds = [int(j) for j in gt_inds]
            used_gt_inds = set(gt_inds)
            possible_gt_inds = set(range(num_gt_counts))
            not_used_inds = list(possible_gt_inds - used_gt_inds)
            gt_inds = list(gt_inds) + not_used_inds
            inds.append((np.asarray(y_inds, dtype=np.int64),
                         np.asarray(gt_inds, dtype=np.int64)))
        return inds


if __name__ == "__main__":
    key = jax.random.PRNGKey(0)
    kp, kt = jax.random.split(key)

    B, N, M, D = 2, 8, 8, 32
    predictions = jax.random.uniform(kp, (B, N, D), dtype=jnp.float32)
    targets = jax.random.uniform(kt, (B, M, D), dtype=jnp.float32) + 0.1

    # Make the trailing gt rows all-zero (padding), as the module expects.
    mask = np.ones((B, M, 1), dtype=np.float32)
    mask[0, 6:] = 0.0   # batch 0: 6 valid gt rows
    mask[1, 5:] = 0.0   # batch 1: 5 valid gt rows
    targets = targets * jnp.asarray(mask)

    # --- Verify the Pallas cost matrix against a pure-numpy reference ---------
    def ref_cost(y, g, p, power, normalize):
        y = np.asarray(y, np.float64)
        g = np.asarray(g, np.float64)
        if normalize:
            y = y / np.maximum(np.linalg.norm(y, axis=-1, keepdims=True), 1e-12)
            g = g / np.maximum(np.linalg.norm(g, axis=-1, keepdims=True), 1e-12)
        diff = np.abs(y[:, :, None, :] - g[:, None, :, :])
        d = np.power(np.sum(np.power(diff, p), axis=-1), 1.0 / p)
        return np.power(d, power)

    for (pp, pw, nrm) in [(1.0, 1.0, False),   # default p=1 accumulation path
                          (2.0, 1.0, False),   # MXU p=2 path
                          (2.0, 2.0, True),    # MXU path + normalize + power
                          (1.0, 2.0, True)]:   # p=1 path + normalize + power
        got = np.asarray(jax.block_until_ready(
            pairwise_cost_pallas(predictions, targets, p=pp, power=pw, normalize=nrm)))
        want = ref_cost(predictions, targets, pp, pw, nrm)
        np.testing.assert_allclose(got, want, rtol=1e-4, atol=1e-4)

    # --- Full matcher forward (p=1 default), with host-side Hungarian ---------
    matcher = HungarianMatcherPallas(cost=1, cost_power=1, normalize=False)
    inds = matcher(predictions, targets)

    assert len(inds) == B
    for b, (y_i, g_i) in enumerate(inds):
        assert y_i.dtype == np.int64 and g_i.dtype == np.int64
        assert len(set(g_i.tolist())) == len(g_i)          # gt indices unique
        assert set(g_i.tolist()) <= set(range(M))

    # Exercise the kernel once more and block on it.
    cost_mat = pairwise_cost_pallas(predictions, targets, p=1.0, power=1.0)
    jax.block_until_ready(cost_mat)

    print("KERNEL_OK")
</pallas_src>

<mosaic_0001>
module attributes {stable_mosaic.version = 11 : i64} {
  func.func @_cost_kernel_lp(%arg0: i32, %arg1: i32, %arg2: i32, %arg3: memref<1x8x32xf32, #tpu.memory_space<vmem>>, %arg4: memref<1x32x128xf32, #tpu.memory_space<vmem>>, %arg5: memref<1x8x128xf32, #tpu.memory_space<vmem>>) attributes {dimension_semantics = [#tpu.dimension_semantics<parallel>, #tpu.dimension_semantics<parallel>, #tpu.dimension_semantics<parallel>], iteration_bounds = array<i64: 2, 1, 1>, scalar_prefetch = 0 : i64, scratch_operands = 0 : i64, tpu.core_type = #tpu.core_type<tc>, window_params = [{transform_indices = @transform_0, window_bounds = array<i64: 1, 8, 32>}, {transform_indices = @transform_1, window_bounds = array<i64: 1, 32, 128>}, {transform_indices = @transform_2, window_bounds = array<i64: 1, 8, 128>}]} {
    %c0 = arith.constant 0 : index
    %c0_0 = arith.constant 0 : index
    %c0_1 = arith.constant 0 : index
    %0 = vector.load %arg3[%c0, %c0_0, %c0_1] : memref<1x8x32xf32, #tpu.memory_space<vmem>>, vector<1x8x32xf32>
    %1 = vector.shape_cast %0 : vector<1x8x32xf32> to vector<8x32xf32>
    %c0_2 = arith.constant 0 : index
    %c0_3 = arith.constant 0 : index
    %c0_4 = arith.constant 0 : index
    %2 = vector.load %arg4[%c0_2, %c0_3, %c0_4] : memref<1x32x128xf32, #tpu.memory_space<vmem>>, vector<1x32x128xf32>
    %3 = vector.shape_cast %2 : vector<1x32x128xf32> to vector<32x128xf32>
    %cst = arith.constant 0.000000e+00 : f32
    %4 = vector.broadcast %cst : f32 to vector<8x128xf32>
    %5 = vector.extract_strided_slice %1 {offsets = [0, 0], sizes = [8, 1], strides = [1, 1]} : vector<8x32xf32> to vector<8x1xf32>
    %6 = vector.extract_strided_slice %3 {offsets = [0, 0], sizes = [1, 128], strides = [1, 1]} : vector<32x128xf32> to vector<1x128xf32>
    %7 = vector.broadcast %5 : vector<8x1xf32> to vector<8x128xf32>
    %8 = vector.broadcast %6 : vector<1x128xf32> to vector<8x128xf32>
    %9 = arith.subf %7, %8 : vector<8x128xf32>
    %10 = math.absf %9 : vector<8x128xf32>
    %11 = arith.addf %4, %10 : vector<8x128xf32>
    %12 = vector.extract_strided_slice %1 {offsets = [0, 1], sizes = [8, 1], strides = [1, 1]} : vector<8x32xf32> to vector<8x1xf32>
    %13 = vector.extract_strided_slice %3 {offsets = [1, 0], sizes = [1, 128], strides = [1, 1]} : vector<32x128xf32> to vector<1x128xf32>
    %14 = vector.broadcast %12 : vector<8x1xf32> to vector<8x128xf32>
    %15 = vector.broadcast %13 : vector<1x128xf32> to vector<8x128xf32>
    %16 = arith.subf %14, %15 : vector<8x128xf32>
    %17 = math.absf %16 : vector<8x128xf32>
    %18 = arith.addf %11, %17 : vector<8x128xf32>
    %19 = vector.extract_strided_slice %1 {offsets = [0, 2], sizes = [8, 1], strides = [1, 1]} : vector<8x32xf32> to vector<8x1xf32>
    %20 = vector.extract_strided_slice %3 {offsets = [2, 0], sizes = [1, 128], strides = [1, 1]} : vector<32x128xf32> to vector<1x128xf32>
    %21 = vector.broadcast %19 : vector<8x1xf32> to vector<8x128xf32>
    %22 = vector.broadcast %20 : vector<1x128xf32> to vector<8x128xf32>
    %23 = arith.subf %21, %22 : vector<8x128xf32>
    %24 = math.absf %23 : vector<8x128xf32>
    %25 = arith.addf %18, %24 : vector<8x128xf32>
    %26 = vector.extract_strided_slice %1 {offsets = [0, 3], sizes = [8, 1], strides = [1, 1]} : vector<8x32xf32> to vector<8x1xf32>
    %27 = vector.extract_strided_slice %3 {offsets = [3, 0], sizes = [1, 128], strides = [1, 1]} : vector<32x128xf32> to vector<1x128xf32>
    %28 = vector.broadcast %26 : vector<8x1xf32> to vector<8x128xf32>
    %29 = vector.broadcast %27 : vector<1x128xf32> to vector<8x128xf32>
    %30 = arith.subf %28, %29 : vector<8x128xf32>
    %31 = math.absf %30 : vector<8x128xf32>
    %32 = arith.addf %25, %31 : vector<8x128xf32>
    %33 = vector.extract_strided_slice %1 {offsets = [0, 4], sizes = [8, 1], strides = [1, 1]} : vector<8x32xf32> to vector<8x1xf32>
    %34 = vector.extract_strided_slice %3 {offsets = [4, 0], sizes = [1, 128], strides = [1, 1]} : vector<32x128xf32> to vector<1x128xf32>
    %35 = vector.broadcast %33 : vector<8x1xf32> to vector<8x128xf32>
    %36 = vector.broadcast %34 : vector<1x128xf32> to vector<8x128xf32>
    %37 = arith.subf %35, %36 : vector<8x128xf32>
    %38 = math.absf %37 : vector<8x128xf32>
    %39 = arith.addf %32, %38 : vector<8x128xf32>
    %40 = vector.extract_strided_slice %1 {offsets = [0, 5], sizes = [8, 1], strides = [1, 1]} : vector<8x32xf32> to vector<8x1xf32>
    %41 = vector.extract_strided_slice %3 {offsets = [5, 0], sizes = [1, 128], strides = [1, 1]} : vector<32x128xf32> to vector<1x128xf32>
    %42 = vector.broadcast %40 : vector<8x1xf32> to vector<8x128xf32>
    %43 = vector.broadcast %41 : vector<1x128xf32> to vector<8x128xf32>
    %44 = arith.subf %42, %43 : vector<8x128xf32>
    %45 = math.absf %44 : vector<8x128xf32>
    %46 = arith.addf %39, %45 : vector<8x128xf32>
    %47 = vector.extract_strided_slice %1 {offsets = [0, 6], sizes = [8, 1], strides = [1, 1]} : vector<8x32xf32> to vector<8x1xf32>
    %48 = vector.extract_strided_slice %3 {offsets = [6, 0], sizes = [1, 128], strides = [1, 1]} : vector<32x128xf32> to vector<1x128xf32>
    %49 = vector.broadcast %47 : vector<8x1xf32> to vector<8x128xf32>
    %50 = vector.broadcast %48 : vector<1x128xf32> to vector<8x128xf32>
    %51 = arith.subf %49, %50 : vector<8x128xf32>
    %52 = math.absf %51 : vector<8x128xf32>
    %53 = arith.addf %46, %52 : vector<8x128xf32>
    %54 = vector.extract_strided_slice %1 {offsets = [0, 7], sizes = [8, 1], strides = [1, 1]} : vector<8x32xf32> to vector<8x1xf32>
    %55 = vector.extract_strided_slice %3 {offsets = [7, 0], sizes = [1, 128], strides = [1, 1]} : vector<32x128xf32> to vector<1x128xf32>
    %56 = vector.broadcast %54 : vector<8x1xf32> to vector<8x128xf32>
    %57 = vector.broadcast %55 : vector<1x128xf32> to vector<8x128xf32>
    %58 = arith.subf %56, %57 : vector<8x128xf32>
    %59 = math.absf %58 : vector<8x128xf32>
    %60 = arith.addf %53, %59 : vector<8x128xf32>
    %61 = vector.extract_strided_slice %1 {offsets = [0, 8], sizes = [8, 1], strides = [1, 1]} : vector<8x32xf32> to vector<8x1xf32>
    %62 = vector.extract_strided_slice %3 {offsets = [8, 0], sizes = [1, 128], strides = [1, 1]} : vector<32x128xf32> to vector<1x128xf32>
    %63 = vector.broadcast %61 : vector<8x1xf32> to vector<8x128xf32>
    %64 = vector.broadcast %62 : vector<1x128xf32> to vector<8x128xf32>
    %65 = arith.subf %63, %64 : vector<8x128xf32>
    %66 = math.absf %65 : vector<8x128xf32>
    %67 = arith.addf %60, %66 : vector<8x128xf32>
    %68 = vector.extract_strided_slice %1 {offsets = [0, 9], sizes = [8, 1], strides = [1, 1]} : vector<8x32xf32> to vector<8x1xf32>
    %69 = vector.extract_strided_slice %3 {offsets = [9, 0], sizes = [1, 128], strides = [1, 1]} : vector<32x128xf32> to vector<1x128xf32>
    %70 = vector.broadcast %68 : vector<8x1xf32> to vector<8x128xf32>
    %71 = vector.broadcast %69 : vector<1x128xf32> to vector<8x128xf32>
    %72 = arith.subf %70, %71 : vector<8x128xf32>
    %73 = math.absf %72 : vector<8x128xf32>
    %74 = arith.addf %67, %73 : vector<8x128xf32>
    %75 = vector.extract_strided_slice %1 {offsets = [0, 10], sizes = [8, 1], strides = [1, 1]} : vector<8x32xf32> to vector<8x1xf32>
    %76 = vector.extract_strided_slice %3 {offsets = [10, 0], sizes = [1, 128], strides = [1, 1]} : vector<32x128xf32> to vector<1x128xf32>
    %77 = vector.broadcast %75 : vector<8x1xf32> to vector<8x128xf32>
    %78 = vector.broadcast %76 : vector<1x128xf32> to vector<8x128xf32>
    %79 = arith.subf %77, %78 : vector<8x128xf32>
    %80 = math.absf %79 : vector<8x128xf32>
    %81 = arith.addf %74, %80 : vector<8x128xf32>
    %82 = vector.extract_strided_slice %1 {offsets = [0, 11], sizes = [8, 1], strides = [1, 1]} : vector<8x32xf32> to vector<8x1xf32>
    %83 = vector.extract_strided_slice %3 {offsets = [11, 0], sizes = [1, 128], strides = [1, 1]} : vector<32x128xf32> to vector<1x128xf32>
    %84 = vector.broadcast %82 : vector<8x1xf32> to vector<8x128xf32>
    %85 = vector.broadcast %83 : vector<1x128xf32> to vector<8x128xf32>
    %86 = arith.subf %84, %85 : vector<8x128xf32>
    %87 = math.absf %86 : vector<8x128xf32>
    %88 = arith.addf %81, %87 : vector<8x128xf32>
    %89 = vector.extract_strided_slice %1 {offsets = [0, 12], sizes = [8, 1], strides = [1, 1]} : vector<8x32xf32> to vector<8x1xf32>
    %90 = vector.extract_strided_slice %3 {offsets = [12, 0], sizes = [1, 128], strides = [1, 1]} : vector<32x128xf32> to vector<1x128xf32>
    %91 = vector.broadcast %89 : vector<8x1xf32> to vector<8x128xf32>
    %92 = vector.broadcast %90 : vector<1x128xf32> to vector<8x128xf32>
    %93 = arith.subf %91, %92 : vector<8x128xf32>
    %94 = math.absf %93 : vector<8x128xf32>
    %95 = arith.addf %88, %94 : vector<8x128xf32>
    %96 = vector.extract_strided_slice %1 {offsets = [0, 13], sizes = [8, 1], strides = [1, 1]} : vector<8x32xf32> to vector<8x1xf32>
    %97 = vector.extract_strided_slice %3 {offsets = [13, 0], sizes = [1, 128], strides = [1, 1]} : vector<32x128xf32> to vector<1x128xf32>
    %98 = vector.broadcast %96 : vector<8x1xf32> to vector<8x128xf32>
    %99 = vector.broadcast %97 : vector<1x128xf32> to vector<8x128xf32>
    %100 = arith.subf %98, %99 : vector<8x128xf32>
    %101 = math.absf %100 : vector<8x128xf32>
    %102 = arith.addf %95, %101 : vector<8x128xf32>
    %103 = vector.extract_strided_slice %1 {offsets = [0, 14], sizes = [8, 1], strides = [1, 1]} : vector<8x32xf32> to vector<8x1xf32>
    %104 = vector.extract_strided_slice %3 {offsets = [14, 0], sizes = [1, 128], strides = [1, 1]} : vector<32x128xf32> to vector<1x128xf32>
    %105 = vector.broadcast %103 : vector<8x1xf32> to vector<8x128xf32>
    %106 = vector.broadcast %104 : vector<1x128xf32> to vector<8x128xf32>
    %107 = arith.subf %105, %106 : vector<8x128xf32>
    %108 = math.absf %107 : vector<8x128xf32>
    %109 = arith.addf %102, %108 : vector<8x128xf32>
    %110 = vector.extract_strided_slice %1 {offsets = [0, 15], sizes = [8, 1], strides = [1, 1]} : vector<8x32xf32> to vector<8x1xf32>
    %111 = vector.extract_strided_slice %3 {offsets = [15, 0], sizes = [1, 128], strides = [1, 1]} : vector<32x128xf32> to vector<1x128xf32>
    %112 = vector.broadcast %110 : vector<8x1xf32> to vector<8x128xf32>
    %113 = vector.broadcast %111 : vector<1x128xf32> to vector<8x128xf32>
    %114 = arith.subf %112, %113 : vector<8x128xf32>
    %115 = math.absf %114 : vector<8x128xf32>
    %116 = arith.addf %109, %115 : vector<8x128xf32>
    %117 = vector.extract_strided_slice %1 {offsets = [0, 16], sizes = [8, 1], strides = [1, 1]} : vector<8x32xf32> to vector<8x1xf32>
    %118 = vector.extract_strided_slice %3 {offsets = [16, 0], sizes = [1, 128], strides = [1, 1]} : vector<32x128xf32> to vector<1x128xf32>
    %119 = vector.broadcast %117 : vector<8x1xf32> to vector<8x128xf32>
    %120 = vector.broadcast %118 : vector<1x128xf32> to vector<8x128xf32>
    %121 = arith.subf %119, %120 : vector<8x128xf32>
    %122 = math.absf %121 : vector<8x128xf32>
    %123 = arith.addf %116, %122 : vector<8x128xf32>
    %124 = vector.extract_strided_slice %1 {offsets = [0, 17], sizes = [8, 1], strides = [1, 1]} : vector<8x32xf32> to vector<8x1xf32>
    %125 = vector.extract_strided_slice %3 {offsets = [17, 0], sizes = [1, 128], strides = [1, 1]} : vector<32x128xf32> to vector<1x128xf32>
    %126 = vector.broadcast %124 : vector<8x1xf32> to vector<8x128xf32>
    %127 = vector.broadcast %125 : vector<1x128xf32> to vector<8x128xf32>
    %128 = arith.subf %126, %127 : vector<8x128xf32>
    %129 = math.absf %128 : vector<8x128xf32>
    %130 = arith.addf %123, %129 : vector<8x128xf32>
    %131 = vector.extract_strided_slice %1 {offsets = [0, 18], sizes = [8, 1], strides = [1, 1]} : vector<8x32xf32> to vector<8x1xf32>
    %132 = vector.extract_strided_slice %3 {offsets = [18, 0], sizes = [1, 128], strides = [1, 1]} : vector<32x128xf32> to vector<1x128xf32>
    %133 = vector.broadcast %131 : vector<8x1xf32> to vector<8x128xf32>
    %134 = vector.broadcast %132 : vector<1x128xf32> to vector<8x128xf32>
    %135 = arith.subf %133, %134 : vector<8x128xf32>
    %136 = math.absf %135 : vector<8x128xf32>
    %137 = arith.addf %130, %136 : vector<8x128xf32>
    %138 = vector.extract_strided_slice %1 {offsets = [0, 19], sizes = [8, 1], strides = [1, 1]} : vector<8x32xf32> to vector<8x1xf32>
    %139 = vector.extract_strided_slice %3 {offsets = [19, 0], sizes = [1, 128], strides = [1, 1]} : vector<32x128xf32> to vector<1x128xf32>
    %140 = vector.broadcast %138 : vector<8x1xf32> to vector<8x128xf32>
    %141 = vector.broadcast %139 : vector<1x128xf32> to vector<8x128xf32>
    %142 = arith.subf %140, %141 : vector<8x128xf32>
    %143 = math.absf %142 : vector<8x128xf32>
    %144 = arith.addf %137, %143 : vector<8x128xf32>
    %145 = vector.extract_strided_slice %1 {offsets = [0, 20], sizes = [8, 1], strides = [1, 1]} : vector<8x32xf32> to vector<8x1xf32>
    %146 = vector.extract_strided_slice %3 {offsets = [20, 0], sizes = [1, 128], strides = [1, 1]} : vector<32x128xf32> to vector<1x128xf32>
    %147 = vector.broadcast %145 : vector<8x1xf32> to vector<8x128xf32>
    %148 = vector.broadcast %146 : vector<1x128xf32> to vector<8x128xf32>
    %149 = arith.subf %147, %148 : vector<8x128xf32>
    %150 = math.absf %149 : vector<8x128xf32>
    %151 = arith.addf %144, %150 : vector<8x128xf32>
    %152 = vector.extract_strided_slice %1 {offsets = [0, 21], sizes = [8, 1], strides = [1, 1]} : vector<8x32xf32> to vector<8x1xf32>
    %153 = vector.extract_strided_slice %3 {offsets = [21, 0], sizes = [1, 128], strides = [1, 1]} : vector<32x128xf32> to vector<1x128xf32>
    %154 = vector.broadcast %152 : vector<8x1xf32> to vector<8x128xf32>
    %155 = vector.broadcast %153 : vector<1x128xf32> to vector<8x128xf32>
    %156 = arith.subf %154, %155 : vector<8x128xf32>
    %157 = math.absf %156 : vector<8x128xf32>
    %158 = arith.addf %151, %157 : vector<8x128xf32>
    %159 = vector.extract_strided_slice %1 {offsets = [0, 22], sizes = [8, 1], strides = [1, 1]} : vector<8x32xf32> to vector<8x1xf32>
    %160 = vector.extract_strided_slice %3 {offsets = [22, 0], sizes = [1, 128], strides = [1, 1]} : vector<32x128xf32> to vector<1x128xf32>
    %161 = vector.broadcast %159 : vector<8x1xf32> to vector<8x128xf32>
    %162 = vector.broadcast %160 : vector<1x128xf32> to vector<8x128xf32>
    %163 = arith.subf %161, %162 : vector<8x128xf32>
    %164 = math.absf %163 : vector<8x128xf32>
    %165 = arith.addf %158, %164 : vector<8x128xf32>
    %166 = vector.extract_strided_slice %1 {offsets = [0, 23], sizes = [8, 1], strides = [1, 1]} : vector<8x32xf32> to vector<8x1xf32>
    %167 = vector.extract_strided_slice %3 {offsets = [23, 0], sizes = [1, 128], strides = [1, 1]} : vector<32x128xf32> to vector<1x128xf32>
    %168 = vector.broadcast %166 : vector<8x1xf32> to vector<8x128xf32>
    %169 = vector.broadcast %167 : vector<1x128xf32> to vector<8x128xf32>
    %170 = arith.subf %168, %169 : vector<8x128xf32>
    %171 = math.absf %170 : vector<8x128xf32>
    %172 = arith.addf %165, %171 : vector<8x128xf32>
    %173 = vector.extract_strided_slice %1 {offsets = [0, 24], sizes = [8, 1], strides = [1, 1]} : vector<8x32xf32> to vector<8x1xf32>
    %174 = vector.extract_strided_slice %3 {offsets = [24, 0], sizes = [1, 128], strides = [1, 1]} : vector<32x128xf32> to vector<1x128xf32>
    %175 = vector.broadcast %173 : vector<8x1xf32> to vector<8x128xf32>
    %176 = vector.broadcast %174 : vector<1x128xf32> to vector<8x128xf32>
    %177 = arith.subf %175, %176 : vector<8x128xf32>
    %178 = math.absf %177 : vector<8x128xf32>
    %179 = arith.addf %172, %178 : vector<8x128xf32>
    %180 = vector.extract_strided_slice %1 {offsets = [0, 25], sizes = [8, 1], strides = [1, 1]} : vector<8x32xf32> to vector<8x1xf32>
    %181 = vector.extract_strided_slice %3 {offsets = [25, 0], sizes = [1, 128], strides = [1, 1]} : vector<32x128xf32> to vector<1x128xf32>
    %182 = vector.broadcast %180 : vector<8x1xf32> to vector<8x128xf32>
    %183 = vector.broadcast %181 : vector<1x128xf32> to vector<8x128xf32>
    %184 = arith.subf %182, %183 : vector<8x128xf32>
    %185 = math.absf %184 : vector<8x128xf32>
    %186 = arith.addf %179, %185 : vector<8x128xf32>
    %187 = vector.extract_strided_slice %1 {offsets = [0, 26], sizes = [8, 1], strides = [1, 1]} : vector<8x32xf32> to vector<8x1xf32>
    %188 = vector.extract_strided_slice %3 {offsets = [26, 0], sizes = [1, 128], strides = [1, 1]} : vector<32x128xf32> to vector<1x128xf32>
    %189 = vector.broadcast %187 : vector<8x1xf32> to vector<8x128xf32>
    %190 = vector.broadcast %188 : vector<1x128xf32> to vector<8x128xf32>
    %191 = arith.subf %189, %190 : vector<8x128xf32>
    %192 = math.absf %191 : vector<8x128xf32>
    %193 = arith.addf %186, %192 : vector<8x128xf32>
    %194 = vector.extract_strided_slice %1 {offsets = [0, 27], sizes = [8, 1], strides = [1, 1]} : vector<8x32xf32> to vector<8x1xf32>
    %195 = vector.extract_strided_slice %3 {offsets = [27, 0], sizes = [1, 128], strides = [1, 1]} : vector<32x128xf32> to vector<1x128xf32>
    %196 = vector.broadcast %194 : vector<8x1xf32> to vector<8x128xf32>
    %197 = vector.broadcast %195 : vector<1x128xf32> to vector<8x128xf32>
    %198 = arith.subf %196, %197 : vector<8x128xf32>
    %199 = math.absf %198 : vector<8x128xf32>
    %200 = arith.addf %193, %199 : vector<8x128xf32>
    %201 = vector.extract_strided_slice %1 {offsets = [0, 28], sizes = [8, 1], strides = [1, 1]} : vector<8x32xf32> to vector<8x1xf32>
    %202 = vector.extract_strided_slice %3 {offsets = [28, 0], sizes = [1, 128], strides = [1, 1]} : vector<32x128xf32> to vector<1x128xf32>
    %203 = vector.broadcast %201 : vector<8x1xf32> to vector<8x128xf32>
    %204 = vector.broadcast %202 : vector<1x128xf32> to vector<8x128xf32>
    %205 = arith.subf %203, %204 : vector<8x128xf32>
    %206 = math.absf %205 : vector<8x128xf32>
    %207 = arith.addf %200, %206 : vector<8x128xf32>
    %208 = vector.extract_strided_slice %1 {offsets = [0, 29], sizes = [8, 1], strides = [1, 1]} : vector<8x32xf32> to vector<8x1xf32>
    %209 = vector.extract_strided_slice %3 {offsets = [29, 0], sizes = [1, 128], strides = [1, 1]} : vector<32x128xf32> to vector<1x128xf32>
    %210 = vector.broadcast %208 : vector<8x1xf32> to vector<8x128xf32>
    %211 = vector.broadcast %209 : vector<1x128xf32> to vector<8x128xf32>
    %212 = arith.subf %210, %211 : vector<8x128xf32>
    %213 = math.absf %212 : vector<8x128xf32>
    %214 = arith.addf %207, %213 : vector<8x128xf32>
    %215 = vector.extract_strided_slice %1 {offsets = [0, 30], sizes = [8, 1], strides = [1, 1]} : vector<8x32xf32> to vector<8x1xf32>
    %216 = vector.extract_strided_slice %3 {offsets = [30, 0], sizes = [1, 128], strides = [1, 1]} : vector<32x128xf32> to vector<1x128xf32>
    %217 = vector.broadcast %215 : vector<8x1xf32> to vector<8x128xf32>
    %218 = vector.broadcast %216 : vector<1x128xf32> to vector<8x128xf32>
    %219 = arith.subf %217, %218 : vector<8x128xf32>
    %220 = math.absf %219 : vector<8x128xf32>
    %221 = arith.addf %214, %220 : vector<8x128xf32>
    %222 = vector.extract_strided_slice %1 {offsets = [0, 31], sizes = [8, 1], strides = [1, 1]} : vector<8x32xf32> to vector<8x1xf32>
    %223 = vector.extract_strided_slice %3 {offsets = [31, 0], sizes = [1, 128], strides = [1, 1]} : vector<32x128xf32> to vector<1x128xf32>
    %224 = vector.broadcast %222 : vector<8x1xf32> to vector<8x128xf32>
    %225 = vector.broadcast %223 : vector<1x128xf32> to vector<8x128xf32>
    %226 = arith.subf %224, %225 : vector<8x128xf32>
    %227 = math.absf %226 : vector<8x128xf32>
    %228 = arith.addf %221, %227 : vector<8x128xf32>
    %c0_5 = arith.constant 0 : index
    %c0_6 = arith.constant 0 : index
    %c0_7 = arith.constant 0 : index
    %229 = vector.load %arg5[%c0_5, %c0_6, %c0_7] : memref<1x8x128xf32, #tpu.memory_space<vmem>>, vector<1x8x128xf32>
    %230 = vector.shape_cast %229 : vector<1x8x128xf32> to vector<8x128xf32>
    %231 = vector.shape_cast %228 : vector<8x128xf32> to vector<1x8x128xf32>
    tpu.vector_store %arg5[%c0_5, %c0_6, %c0_7], %231 {strides = array<i32>} : memref<1x8x128xf32, #tpu.memory_space<vmem>>, vector<1x8x128xf32>,
    return
  }
  func.func @transform_0(%arg0: i32, %arg1: i32, %arg2: i32) -> (i32, i32, i32) {
    %c0_i32 = arith.constant 0 : i32
    %c0_i32_0 = arith.constant 0 : i32
    return %arg0, %arg1, %c0_i32 : i32, i32, i32
  }
  func.func @transform_1(%arg0: i32, %arg1: i32, %arg2: i32) -> (i32, i32, i32) {
    %c0_i32 = arith.constant 0 : i32
    %c0_i32_0 = arith.constant 0 : i32
    return %arg0, %c0_i32, %arg2 : i32, i32, i32
  }
  func.func @transform_2(%arg0: i32, %arg1: i32, %arg2: i32) -> (i32, i32, i32) {
    %c0_i32 = arith.constant 0 : i32
    return %arg0, %arg1, %arg2 : i32, i32, i32
  }
}

</mosaic_0001>

<bundles_post_ra>
// kernel: pairwise_cost_pallas.1
= control target key start
LH: loop header
LB: loop body
LE: loop exit
PB: predicated region body
PF: predicated region fallthrough
CT: control target
= control target key end

     0   :  { %7 = vsyncpa [#allocation3], 0  ;;  %s983_s0 = inlined_call_operand.vmem [shape: f32[2,8,32], index: 0, kind: input, shape index: {}]   ;;  %s984_s1 = inlined_call_operand.vmem [shape: f32[2,32,128], index: 1, kind: input, shape index: {}]   ;;  %s985_s2 = inlined_call_operand.hbm [shape: f32[2,8,128], index: 2, kind: output, shape index: {}]  }
   0x1   :  { %9 = vsyncpa [#allocation3 + $0x1], 0  ;;  %s839_s9 = smov 0   ;;  %s841_s10 = smov 0  }
   0x2   :  { %s843_s11 = smov 0   ;;  %s845_s12 = smov 0  }
   0x3   :  { %s847_s13 = smov 0   ;;  %s849_s14 = smov 0  }
   0x4 LB: > { %s578_s15 = sadd.s32 4294967295, %s790_s14   ;;  %s579_s16 = sadd.s32 4294967294, %s790_s14   ;;  %s790_s14 = sphi %s849_s14, %s15_s14   ;;  %s786_s13 = sphi %s847_s13, %s992_s13   ;;  %s782_s12 = sphi %s845_s12, %s991_s12   ;;  %s778_s11 = sphi %s843_s11, %s990_s11   ;;  %s774_s10 = sphi %s841_s10, %s989_s10   ;;  %s770_s9 = sphi %s839_s9, %s988_s9  }
   0x5   : > { %s34_s17 = sadd.s32 1, %s786_s13  ;;  %s101_s18 = sadd.s32 1, %s778_s11 }
   0x6   : > { %p36_p0 = scmp.ge.s32.totalorder %s34_s17, 2  ;;  %p111_p1 = scmp.ne.s32.totalorder %s778_s11, %s774_s10 }
   0x7   : > { %p112_p2 = scmp.eq.s32.totalorder %s578_s15, 1  ;;  %p117_p3 = scmp.ne.s32.totalorder %s774_s10, %s770_s9 }
   0x8   : > { %s994_s17 = smov (%p36_p0, %s34_s17), 0  ;;  %p118_p5 = scmp.eq.s32.totalorder %s579_s16, 1 }
   0x9   : > { %p879_p4 = por %p112_p2, %p111_p1  ;;  %s94_s20 = ssub.s32 %s786_s13, %s994_s17 }
   0xa   : > { %p582_p6 = scmp.ge.s32.totalorder %s790_s14, 1  ;;  %p99_p7 = scmp.eq.s32.totalorder %s94_s20, 0 }
   0xb   : > { %p886_p8 = por %p118_p5, %p117_p3  ;;  %p157_p9 = scmp.lt.s32.totalorder %s790_s14, 3 }
   0xc   : > { %s892_s22 = scalar_select %p99_p7, %s778_s11, %s101_s18  }
   0xd   : > { %p158_p10 = pnand %p582_p6, %p157_p9 }
   0xe   : > { %p189_p11 = scmp.lt.s32.totalorder (!%p158_p10), %s782_s12, 1  ;;  %s186_s4 = sand.u32 (!%p158_p10), 1, %s774_s10  }
   0xf   : > { %161 = sbr.rel (%p158_p10) target bundleno = 257 (0x101), region = 28  ;;  %s583_s5 = sshll.u32 (!%p158_p10), %s186_s4, 3 }
  0x10   : > { %s588_s6 = sshll.u32 (!%p158_p10), %s782_s12, 3  ;;  %s188_s16 = scalar_lea.vmem (!%p158_p10), [#allocation2], %s583_s5 }
  0x11   : > { %s480_s15 = scalar_lea.hbm (!%p158_p10), %s985_s2, %s588_s6  ;;  %s482_s18 = sshll.u32 (!%p158_p10), %s188_s16, 4  ;;  %s483_s18 = int_to_ptr.vmem [resolvable:$true] %s482_s18 }
  0x12   : > { %s484_s20 = sshll.u32 (!%p158_p10), %s480_s15, 4  ;;  %s485_s20 = int_to_ptr.hbm [resolvable:$true] %s484_s20 }
  0x14   : > { %v792_v0 = vmov 2   ;;  %v793_v1 = vmov 0   ;;  %s896_s23 = scalar_select %p189_p11, %s782_s12, 1  ;;  %v794_v2 = vmov 4   ;;  %v795_v4 = vmov 3  }
  0x15   : > { %681 = vset.pattern.permute.xlu1 %v792_v0  ;;  %679 = vset.pattern.permute.xlu0 %v793_v1  ;;  %v796_v5 = vmov 1   ;;  %v797_v6 = vmov 5   ;;  %v798_v7 = vmov 6   ;;  %v799_v8 = vmov 8   ;;  %s468_s12 = scalar_lea.sflag [#allocation3], %s186_s4 }
  0x16   : > { %683 = vset.pattern.permute.xlu2 %v794_v2  ;;  %s584_s24 = sshll.u32 %s896_s23, 3  ;;  %v800_v9 = vmov 7   ;;  %v801_v10 = vmov 9   ;;  %v802_v11 = vmov 13   ;;  %v803_v12 = vmov 10   ;;  %s591_s28 = sshll.u32 %s896_s23, 5 }
  0x17   : > { %s195_s27 = scalar_lea.vmem %s983_s0, %s584_s24  ;;  %v804_v13 = vmov 11   ;;  %v805_v14 = vmov 18   ;;  %v806_v15 = vmov 12   ;;  %v807_v16 = vmov 14   ;;  %s940_s3 = scalar_lea.vmem %s984_s1, %s591_s28 }
  0x18   : > { %v902_v3 = vld [vmem:[%s195_s27] sm:$0xff]  ;;  %v808_v17 = vmov 23   ;;  %v809_v18 = vmov 15   ;;  %v810_v19 = vmov 16   ;;  %v811_v20 = vmov 17   ;;  %s726_s23 = sshra.s32 %s485_s20, 4  ;;  %s727_s23 = int_to_ptr.hbm [resolvable:$true] %s726_s23 }
  0x19   : > { %227 = vperm.xlu1 %681, %v902_v3   ;;  %211 = vperm.xlu0 %679, %v902_v3   ;;  %v812_v21 = vmov 28   ;;  %v813_v22 = vmov 19   ;;  %v814_v23 = vmov 20   ;;  %v815_v24 = vmov 31   ;;  %v205_v37 = vld [vmem:[%s940_s3] sm:$0xff]  ;;  %s728_s24 = scalar_lea.hbm %s727_s23, 8  ;;  %p733_p1 = scmp.lt.s32.totalorder %s727_s23, %s985_s2 }
  0x1a   : > { %243 = vperm.xlu2 %683, %v902_v3   ;;  %v816_v25 = vmov 21   ;;  %v817_v26 = vmov 22   ;;  %v818_v27 = vmov 24   ;;  %v819_v28 = vmov 25   ;;  %p729_p12 = scmp.ne.s32.totalorder %s727_s23, %s728_s24  ;;  %s732_s27 = scalar_lea.hbm %s985_s2, 16 }
  0x1b   : > { %v820_v29 = vmov 26   ;;  %v821_v30 = vmov 27   ;;  %v822_v31 = vmov 29   ;;  %v823_v32 = vmov 30   ;;  %p734_p2 = scmp.lt.s32.totalorder %s732_s27, %s728_s24 }
  0x1c   : > { %v214_v38 = vperm.slane %v205_v37, 0  ;;  %v222_v40 = vperm.slane %v205_v37, 1  ;;  %v230_v41 = vperm.slane %v205_v37, 2  ;;  %v238_v48 = vperm.slane %v205_v37, 3  ;;  %p730_p13 = pnand %p729_p12, %p879_p4 }
  0x1d   : > { %v246_v52 = vperm.slane %v205_v37, 4  ;;  %v254_v55 = vperm.slane %v205_v37, 5  ;;  %v262_v62 = vperm.slane %v205_v37, 6  ;;  %p735_p3 = por %p734_p2, %p733_p1 }
  0x1e   : > { %p731_p0 = pneg %p730_p13 }
  0x20   : > { %p736_p5 = pnand %p735_p3, %p731_p0 }
  0x21   : > { %682 = vset.pattern.permute.xlu1 %v795_v4  ;;  %680 = vset.pattern.permute.xlu0 %v796_v5  ;;  %v206_v4 = vld [vmem:[%s940_s3 + $0x8] sm:$0xff] }
  0x22   : > { %235 = vperm.xlu1 %682, %v902_v3   ;;  %219 = vperm.xlu0 %680, %v902_v3  }
  0x23   : > { %684 = vset.pattern.permute.xlu2 %v797_v6 }
  0x24   : > { %251 = vperm.xlu2 %684, %v902_v3  }
  0x2a   : > { %685 = vset.pattern.permute.xlu1 %v798_v7  ;;  %687 = vset.pattern.permute.xlu0 %v799_v8 }
  0x2b   : > { %259 = vperm.xlu1 %685, %v902_v3   ;;  %275 = vperm.xlu0 %687, %v902_v3  }
  0x2c   : > { %686 = vset.pattern.permute.xlu2 %v800_v9  ;;  %v278_v9 = vperm.slane %v206_v4, 0 }
  0x2d   : > { %267 = vperm.xlu2 %686, %v902_v3  }
  0x33   : > { %688 = vset.pattern.permute.xlu1 %v801_v10  ;;  %692 = vset.pattern.permute.xlu0 %v802_v11 }
  0x34   : > { %283 = vperm.xlu1 %688, %v902_v3   ;;  %315 = vperm.xlu0 %692, %v902_v3  }
  0x35   : > { %689 = vset.pattern.permute.xlu2 %v803_v12  ;;  %v286_v12 = vperm.slane %v206_v4, 1 }
  0x36   : > { %291 = vperm.xlu2 %689, %v902_v3  }
  0x3c   : > { %690 = vset.pattern.permute.xlu1 %v804_v13  ;;  %697 = vset.pattern.permute.xlu0 %v805_v14 }
  0x3d   : > { %299 = vperm.xlu1 %690, %v902_v3   ;;  %355 = vperm.xlu0 %697, %v902_v3  }
  0x3e   : > { %691 = vset.pattern.permute.xlu2 %v806_v15 }
  0x3f   : > { %307 = vperm.xlu2 %691, %v902_v3  }
  0x45   : > { %693 = vset.pattern.permute.xlu1 %v807_v16  ;;  %702 = vset.pattern.permute.xlu0 %v808_v17  ;;  %v294_v17 = vperm.slane %v206_v4, 2 }
  0x46   : > { %323 = vperm.xlu1 %693, %v902_v3   ;;  %395 = vperm.xlu0 %702, %v902_v3  }
  0x47   : > { %694 = vset.pattern.permute.xlu2 %v809_v18 }
  0x48   : > { %331 = vperm.xlu2 %694, %v902_v3  }
  0x4e   : > { %695 = vset.pattern.permute.xlu1 %v810_v19  ;;  %707 = vset.pattern.permute.xlu0 %v812_v21  ;;  %v302_v21 = vperm.slane %v206_v4, 3 }
  0x4f   : > { %339 = vperm.xlu1 %695, %v902_v3   ;;  %435 = vperm.xlu0 %707, %v902_v3  }
  0x50   : > { %696 = vset.pattern.permute.xlu2 %v811_v20 }
  0x51   : > { %347 = vperm.xlu2 %696, %v902_v3  }
  0x57   : > { %698 = vset.pattern.permute.xlu1 %v813_v22  ;;  %711 = vset.pattern.permute.xlu0 %v815_v24 }
  0x58   : > { %363 = vperm.xlu1 %698, %v902_v3  }
  0x59   : > { %699 = vset.pattern.permute.xlu2 %v814_v23 }
  0x5a   : > { %371 = vperm.xlu2 %699, %v902_v3  }
  0x60   : > { %700 = vset.pattern.permute.xlu1 %v816_v25 }
  0x61   : > { %379 = vperm.xlu1 %700, %v902_v3  }
  0x62   : > { %701 = vset.pattern.permute.xlu2 %v817_v26 }
  0x63   : > { %387 = vperm.xlu2 %701, %v902_v3  }
  0x69   : > { %703 = vset.pattern.permute.xlu1 %v818_v27  ;;  %v310_v27 = vperm.slane %v206_v4, 4 }
  0x6a   : > { %403 = vperm.xlu1 %703, %v902_v3  }
  0x6b   : > { %704 = vset.pattern.permute.xlu2 %v819_v28 }
  0x6c   : > { %411 = vperm.xlu2 %704, %v902_v3  }
  0x72   : > { %705 = vset.pattern.permute.xlu1 %v820_v29 }
  0x73   : > { %419 = vperm.xlu1 %705, %v902_v3  }
  0x74   : > { %706 = vset.pattern.permute.xlu2 %v821_v30  ;;  %v244_v33 = vpop.permute.xlu2 %243 }
  0x75   : > { %427 = vperm.xlu2 %706, %v902_v3   ;;  %v247_v57 = vsub.f32 %v244_v33, %v246_v52 }
  0x77   : > { %v248_v63 = vand.u32 2147483647, %v247_v57 }
  0x7b   : > { %708 = vset.pattern.permute.xlu1 %v822_v31 }
  0x7c   : > { %443 = vperm.xlu1 %708, %v902_v3  }
  0x7d   : > { %709 = vset.pattern.permute.xlu2 %v823_v32  ;;  %v318_v32 = vperm.slane %v206_v4, 5 }
  0x7e   : > { %451 = vperm.xlu2 %709, %v902_v3   ;;  %v252_v34 = vpop.permute.xlu2 %251 }
  0x7f   : > { %v255_v61 = vsub.f32 %v252_v34, %v254_v55 }
  0x81   : > { %v256_v1 = vand.u32 2147483647, %v255_v61 }
  0x84   : > { %710 = vset.pattern.permute.xlu1 %v815_v24 }
  0x85   : > { %459 = vperm.xlu1 %710, %v902_v3   ;;  %v270_v3 = vperm.slane %v205_v37, 7 }
  0x87   : > { %v268_v46 = vpop.permute.xlu2 %267 }
  0x88   : > { %v271_v8 = vsub.f32 %v268_v46, %v270_v3 }
  0x8a   : > { %v272_v14 = vand.u32 2147483647, %v271_v8 }
  0x8b   : > { %v228_v35 = vpop.permute.xlu1 %227  ;;  %v212_v36 = vpop.permute.xlu0 %211 }
  0x8c   : > { %v215_v39 = vsub.f32 %v212_v36, %v214_v38  ;;  %v231_v47 = vsub.f32 %v228_v35, %v230_v41  ;;  %v326_v36 = vperm.slane %v206_v4, 6 }
  0x8e   : > { %v216_v44 = vand.u32 2147483647, %v215_v39  ;;  %v232_v51 = vand.u32 2147483647, %v231_v47 }
  0x90   : > { %v292_v59 = vpop.permute.xlu2 %291 }
  0x91   : > { %v295_v23 = vsub.f32 %v292_v59, %v294_v17 }
  0x93   : > { %v296_v29 = vand.u32 2147483647, %v295_v23 }
  0x94   : > { %v236_v42 = vpop.permute.xlu1 %235  ;;  %v220_v43 = vpop.permute.xlu0 %219 }
  0x95   : > { %v223_v45 = vsub.f32 %v220_v43, %v222_v40  ;;  %v239_v53 = vsub.f32 %v236_v42, %v238_v48  ;;  %v207_v40 = vld [vmem:[%s940_s3 + $0x10] sm:$0xff]  ;;  %v334_v43 = vperm.slane %v206_v4, 7 }
  0x96   : > { %v342_v46 = vperm.slane %v207_v40, 0  ;;  %v350_v52 = vperm.slane %v207_v40, 1  ;;  %v366_v61 = vperm.slane %v207_v40, 3  ;;  %v374_v3 = vperm.slane %v207_v40, 4 }
  0x97   : > { %v224_v49 = vand.u32 2147483647, %v223_v45  ;;  %v240_v58 = vand.u32 2147483647, %v239_v53 }
  0x99   : > { %v225_v50 = vadd.f32 %v224_v49, %v216_v44  ;;  %v308_v11 = vpop.permute.xlu2 %307 }
  0x9a   : > { %v311_v31 = vsub.f32 %v308_v11, %v310_v27 }
  0x9b   : > { %v233_v54 = vadd.f32 %v232_v51, %v225_v50 }
  0x9c   : > { %v312_v38 = vand.u32 2147483647, %v311_v31 }
  0x9d   : > { %v260_v56 = vpop.permute.xlu1 %259  ;;  %v241_v60 = vadd.f32 %v240_v58, %v233_v54  ;;  %v276_v10 = vpop.permute.xlu0 %275  ;;  %v358_v58 = vperm.slane %v207_v40, 2 }
  0x9e   : > { %v263_v2 = vsub.f32 %v260_v56, %v262_v62  ;;  %v279_v15 = vsub.f32 %v276_v10, %v278_v9 }
  0x9f   : > { %v249_v0 = vadd.f32 %v248_v63, %v241_v60 }
  0xa0   : > { %v264_v7 = vand.u32 2147483647, %v263_v2  ;;  %v280_v20 = vand.u32 2147483647, %v279_v15 }
  0xa1   : > { %v257_v6 = vadd.f32 %v256_v1, %v249_v0 }
  0xa2   : > { %v332_v24 = vpop.permute.xlu2 %331 }
  0xa3   : > { %v265_v13 = vadd.f32 %v264_v7, %v257_v6  ;;  %v335_v49 = vsub.f32 %v332_v24, %v334_v43  ;;  %v382_v6 = vperm.slane %v207_v40, 5 }
  0xa5   : > { %v273_v19 = vadd.f32 %v272_v14, %v265_v13  ;;  %v336_v54 = vand.u32 2147483647, %v335_v49  ;;  %v390_v13 = vperm.slane %v207_v40, 6 }
  0xa6   : > { %v284_v5 = vpop.permute.xlu1 %283  ;;  %v316_v34 = vpop.permute.xlu0 %315 }
  0xa7   : > { %v287_v16 = vsub.f32 %v284_v5, %v286_v12  ;;  %v281_v25 = vadd.f32 %v280_v20, %v273_v19  ;;  %v319_v39 = vsub.f32 %v316_v34, %v318_v32  ;;  %v398_v19 = vperm.slane %v207_v40, 7 }
  0xa9   : > { %v288_v22 = vand.u32 2147483647, %v287_v16  ;;  %v320_v45 = vand.u32 2147483647, %v319_v39  ;;  %v208_v16 = vld [vmem:[%s940_s3 + $0x18] sm:$0xff] }
  0xaa   : > { %v422_v34 = vperm.slane %v208_v16, 2 }
  0xab   : > { %v289_v28 = vadd.f32 %v288_v22, %v281_v25  ;;  %v348_v41 = vpop.permute.xlu2 %347  ;;  %v406_v22 = vperm.slane %v208_v16, 0 }
  0xac   : > { %v351_v57 = vsub.f32 %v348_v41, %v350_v52  ;;  %v454_v52 = vperm.slane %v208_v16, 6 }
  0xad   : > { %v297_v35 = vadd.f32 %v296_v29, %v289_v28  ;;  %v414_v29 = vperm.slane %v208_v16, 1 }
  0xae   : > { %v352_v0 = vand.u32 2147483647, %v351_v57 }
  0xaf   : > { %v300_v18 = vpop.permute.xlu1 %299  ;;  %v356_v59 = vpop.permute.xlu0 %355 }
  0xb0   : > { %v303_v26 = vsub.f32 %v300_v18, %v302_v21  ;;  %v359_v1 = vsub.f32 %v356_v59, %v358_v58 }
  0xb2   : > { %v304_v30 = vand.u32 2147483647, %v303_v26  ;;  %v360_v5 = vand.u32 2147483647, %v359_v1 }
  0xb4   : > { %v305_v37 = vadd.f32 %v304_v30, %v297_v35  ;;  %v372_v55 = vpop.permute.xlu2 %371 }
  0xb5   : > { %v375_v9 = vsub.f32 %v372_v55, %v374_v3 }
  0xb6   : > { %v313_v44 = vadd.f32 %v312_v38, %v305_v37 }
  0xb7   : > { %v376_v15 = vand.u32 2147483647, %v375_v9 }
  0xb8   : > { %v324_v33 = vpop.permute.xlu1 %323  ;;  %v321_v50 = vadd.f32 %v320_v45, %v313_v44  ;;  %v396_v20 = vpop.permute.xlu0 %395  ;;  %v438_v44 = vperm.slane %v208_v16, 4 }
  0xb9   : > { %v327_v42 = vsub.f32 %v324_v33, %v326_v36  ;;  %v399_v26 = vsub.f32 %v396_v20, %v398_v19  ;;  %v430_v36 = vperm.slane %v208_v16, 3 }
  0xbb   : > { %v328_v48 = vand.u32 2147483647, %v327_v42  ;;  %v400_v31 = vand.u32 2147483647, %v399_v26 }
  0xbd   : > { %v329_v53 = vadd.f32 %v328_v48, %v321_v50  ;;  %v388_v7 = vpop.permute.xlu2 %387 }
  0xbe   : > { %v391_v18 = vsub.f32 %v388_v7, %v390_v13 }
  0xbf   : > { %v337_v60 = vadd.f32 %v336_v54, %v329_v53 }
  0xc0   : > { %v392_v25 = vand.u32 2147483647, %v391_v18 }
  0xc1   : > { %v340_v47 = vpop.permute.xlu1 %339  ;;  %v436_v45 = vpop.permute.xlu0 %435 }
  0xc2   : > { %v343_v51 = vsub.f32 %v340_v47, %v342_v46  ;;  %v446_v47 = vperm.slane %v208_v16, 5  ;;  %v439_v50 = vsub.f32 %v436_v45, %v438_v44 }
  0xc4   : > { %v344_v56 = vand.u32 2147483647, %v343_v51 }
  0xc6   : > { %v345_v63 = vadd.f32 %v344_v56, %v337_v60  ;;  %v412_v23 = vpop.permute.xlu2 %411  ;;  %v440_v56 = vand.u32 2147483647, %v439_v50  ;;  %v462_v60 = vperm.slane %v208_v16, 7 }
  0xc7   : > { %v415_v33 = vsub.f32 %v412_v23, %v414_v29 }
  0xc8   : > { %v353_v4 = vadd.f32 %v352_v0, %v345_v63 }
  0xc9   : > { %v416_v40 = vand.u32 2147483647, %v415_v33 }
  0xca   : > { %v364_v62 = vpop.permute.xlu1 %363  ;;  %v361_v11 = vadd.f32 %v360_v5, %v353_v4 }
  0xcb   : > { %v367_v2 = vsub.f32 %v364_v62, %v366_v61 }
  0xcd   : > { %v368_v8 = vand.u32 2147483647, %v367_v2 }
  0xcf   : > { %v369_v14 = vadd.f32 %v368_v8, %v361_v11  ;;  %v428_v38 = vpop.permute.xlu2 %427 }
  0xd0   : > { %v431_v43 = vsub.f32 %v428_v38, %v430_v36 }
  0xd1   : > { %v377_v21 = vadd.f32 %v376_v15, %v369_v14 }
  0xd2   : > { %v432_v49 = vand.u32 2147483647, %v431_v43 }
  0xd3   : > { %v380_v10 = vpop.permute.xlu1 %379 }
  0xd4   : > { %v383_v12 = vsub.f32 %v380_v10, %v382_v6 }
  0xd6   : > { %v384_v17 = vand.u32 2147483647, %v383_v12 }
  0xd8   : > { %v385_v24 = vadd.f32 %v384_v17, %v377_v21  ;;  %v452_v54 = vpop.permute.xlu2 %451 }
  0xd9   : > { %v455_v58 = vsub.f32 %v452_v54, %v454_v52 }
  0xda   : > { %v393_v30 = vadd.f32 %v392_v25, %v385_v24 }
  0xdb   : > { %v456_v62 = vand.u32 2147483647, %v455_v58 }
  0xdc   : > { %v404_v27 = vpop.permute.xlu1 %403  ;;  %v401_v35 = vadd.f32 %v400_v31, %v393_v30 }
  0xdd   : > { %v407_v28 = vsub.f32 %v404_v27, %v406_v22 }
  0xdf   : > { %v408_v32 = vand.u32 2147483647, %v407_v28 }
  0xe1   : > { %v409_v39 = vadd.f32 %v408_v32, %v401_v35 }
  0xe3   : > { %v417_v46 = vadd.f32 %v416_v40, %v409_v39 }
  0xe5   : > { %v420_v37 = vpop.permute.xlu1 %419 }
  0xe6   : > { %v423_v41 = vsub.f32 %v420_v37, %v422_v34 }
  0xe8   : > { %v424_v42 = vand.u32 2147483647, %v423_v41 }
  0xea   : > { %v425_v48 = vadd.f32 %v424_v42, %v417_v46 }
  0xec   : > { %v433_v55 = vadd.f32 %v432_v49, %v425_v48 }
  0xee   : > { %v444_v51 = vpop.permute.xlu1 %443  ;;  %v441_v59 = vadd.f32 %v440_v56, %v433_v55 }
  0xef   : > { %v447_v53 = vsub.f32 %v444_v51, %v446_v47 }
  0xf1   : > { %v448_v57 = vand.u32 2147483647, %v447_v53 }
  0xf3   : > { %v449_v61 = vadd.f32 %v448_v57, %v441_v59 }
  0xf5   : > { %v457_v1 = vadd.f32 %v456_v62, %v449_v61 }
  0xf7   : > { %v460_v63 = vpop.permute.xlu1 %459 }
  0xf8   : > { %v463_v0 = vsub.f32 %v460_v63, %v462_v60 }
  0xfa   : > { %v464_v2 = vand.u32 2147483647, %v463_v0 }
  0xfc   : > { %v465_v3 = vadd.f32 %v464_v2, %v457_v1 }
  0xfe   : > { %466 = vst [vmem:[%s188_s16] sm:$0xff] %v465_v3 }
  0xff   : > { %739 = shalt.err (!%p736_p5)
}
 0x100   : > { %592 = dma.vmem_to_hbm [thread:$0]  (%p879_p4), %s483_s18, 128, %s485_s20, %s468_s12  }
 0x101 PF: > { %p598_p6 = scmp.ge.s32.totalorder %s790_s14, 2  ;;  %s496_s30 = sand.u32 1, %s770_s9  }
 0x102   : > { %s497_s3 = scalar_lea.sflag [#allocation3], %s496_s30 }
 0x103   : > { %p595_p7 = pnand %p598_p6, %p886_p8 }
 0x105   : > { %p596_p9 = pneg %p595_p7 }
 0x107   : > { %765 = dma.done.wait (%p596_p9), %s497_s3, 128  }
 0x108   : > { %767 = vsyncadd (%p596_p9), %s497_s3, 4294967168  ;;  %s15_s14 = sadd.s32 1, %s790_s14   ;;  %s988_s9 = smov %s774_s10 }
 0x109   : > { %p12_p10 = scmp.ge.s32.totalorder %s15_s14, 4   ;;  %s989_s10 = smov %s778_s11 }
 0x10a   : > { %s990_s11 = smov %s892_s22  ;;  %s991_s12 = smov %s786_s13 }
 0x10b   : > { %s992_s13 = smov %s994_s17  ;;  %14 = sbr.rel (!%p12_p10) target bundleno = 4 (0x4), region = 66 }
 0x110   :  { %503 = vsyncpa [#allocation3], 1 }
 0x111   :  { %505 = vsyncpa [#allocation3 + $0x1], 1 }

</bundles_post_ra>
